<compile_context>
chip_gen: v5e
topology: v5e:2x2
jax: 0.10.0
libtpu: 0.0.40
codegen_flags: <defaults>
</compile_context>

<pallas_src>
import functools
import math

import numpy as np
import jax
import jax.numpy as jnp
from jax import lax
from jax.experimental import pallas as pl
from jax.experimental.pallas import tpu as pltpu

_EPS = 1e-6
_PAD_NEG = -1e9                    # exp(_PAD_NEG / tau) underflows to exactly 0.0
_MIB = 1 << 20


def _round_up(x, mult):
    return ((x + mult - 1) // mult) * mult


def _vmem_capacity_bytes():
    """Per-core VMEM capacity; conservative (v7x-sized) fallback."""
    try:
        return int(pltpu.get_tpu_info().vmem_capacity_bytes)
    except Exception:
        return 64 * _MIB


def _pick_row_tile(m_eff, budget_bytes):
    """Largest multiple of 128 dividing m_eff with tile bytes <= budget."""
    assert m_eff % 128 == 0
    tr = max(128, (budget_bytes // (4 * m_eff)) // 128 * 128)
    tr = min(tr, m_eff)
    while m_eff % tr:
        tr -= 128
    return max(tr, 128)


# ----------------------------------------------------------------------------
# Fused single-block kernel (VMEM-resident fast path)
# ----------------------------------------------------------------------------
def _ccl_fused_kernel(s_ref, out_ref, *, inv_tau, m):
    s = s_ref[...].astype(jnp.float32) * inv_tau
    # Global-max shift: cancels exactly in both row and column normalization
    # (up to the eps regularizer) and guards exp() against overflow.
    s_max = jnp.max(jnp.max(s, axis=1, keepdims=True), axis=0, keepdims=True)
    e = jnp.exp(s - s_max)

    row_sum = jnp.sum(e, axis=1, keepdims=True)                  # (m, 1)
    col_sum = jnp.sum(e, axis=0, keepdims=True)                  # (1, m)
    inv_row = pl.reciprocal(row_sum + _EPS, approx=True)
    inv_col = pl.reciprocal(col_sum + _EPS, approx=True)

    i2t = jnp.minimum(e * inv_row, 1.0)   # clamp guards approx-recip overshoot
    t2i = jnp.minimum(e * inv_col, 1.0)
    i2t_log = jnp.log(1.0 - i2t + _EPS)
    t2i_log = jnp.log(1.0 - t2i + _EPS)

    eye = (lax.broadcasted_iota(jnp.int32, (m, m), 0)
           == lax.broadcasted_iota(jnp.int32, (m, m), 1))

    # diag + (m,1)->(1,m) transposes via the eye mask (VPU/XLU; free under the
    # EUP bound of exp + 2x log).
    i2t_diag = jnp.sum(jnp.where(eye, i2t, 0.0), axis=0, keepdims=True)
    t2i_diag = jnp.sum(jnp.where(eye, t2i, 0.0), axis=0, keepdims=True)
    i2t_log_rowsum = jnp.sum(
        jnp.where(eye, jnp.sum(i2t_log, axis=1, keepdims=True), 0.0),
        axis=0, keepdims=True)                                   # (1, m)
    t2i_log_colsum = jnp.sum(t2i_log, axis=0, keepdims=True)     # (1, m)

    i2t_log_diag = jnp.log(1.0 - i2t_diag + _EPS)
    t2i_log_diag = jnp.log(1.0 - t2i_diag + _EPS)
    loss_i = -jnp.log(i2t_diag + _EPS) - jnp.log(t2i_diag + _EPS)

    zeros = jnp.zeros_like(i2t_diag)
    # lane-dense (8, m) slab:
    # 0 i2t log row-sum, 1 t2i log col-sum, 2 i2t log diag, 3 t2i log diag,
    # 4 infoNCE loss_i, 5-7 padding.
    out_ref[...] = jnp.concatenate(
        [i2t_log_rowsum, t2i_log_colsum, i2t_log_diag, t2i_log_diag,
         loss_i, zeros, zeros, zeros], axis=0)


@functools.partial(jax.jit, static_argnums=(1,))
def _ccl_stats_fused(scores, tau):
    m = scores.shape[0]
    assert scores.shape == (m, m)
    inv_tau = 1.0 / float(tau)
    cap = _vmem_capacity_bytes()
    vmem_limit = int(min(64 * _MIB, max(cap - 16 * _MIB, 32 * _MIB)))
    n_bytes = int(scores.dtype.itemsize)

    stats = pl.pallas_call(
        functools.partial(_ccl_fused_kernel, inv_tau=inv_tau, m=m),
        out_shape=jax.ShapeDtypeStruct((8, m), jnp.float32),
        compiler_params=pltpu.CompilerParams(vmem_limit_bytes=vmem_limit),
        cost_estimate=pl.CostEstimate(
            flops=10 * m * m,
            transcendentals=3 * m * m,
            bytes_accessed=n_bytes * m * m + 4 * 8 * m),
    )(scores)

    return {
        "i2t_log_rowsum": stats[0, :],
        "t2i_log_rowsum": stats[1, :],
        "i2t_log_diag": stats[2, :],
        "t2i_log_diag": stats[3, :],
        "loss_i": stats[4, :],
    }


# ----------------------------------------------------------------------------
# Tiled two-pass path (large M)
# ----------------------------------------------------------------------------
def _ccl_pass1_kernel(s_ref, cpart_ref, stats_ref, *,
                      inv_tau, m, m_eff, tr, padded):
    """exp + i2t (row-normalized) stats + partial column sums of exp(s/tau)."""
    t = pl.program_id(0)
    s = s_ref[...].astype(jnp.float32)
    # TODO(synk): no max-subtraction here (matches the reference); raw
    # un-normalized logit scales could overflow exp.  The fused fast path
    # applies an exact global shift.
    e = jnp.exp(s * inv_tau)                                     # (tr, m_eff)

    # partial column sums (reduced by a tiny XLA add in the wrapper -> the
    # pass stays fully 'parallel' / megacore-shardable).
    cpart_ref[...] = jnp.sum(e, axis=0, keepdims=True).reshape(1, 1, m_eff)

    row_sum = jnp.sum(e, axis=1, keepdims=True)                  # (tr, 1)
    inv_row = pl.reciprocal(row_sum + _EPS, approx=True)
    i2t = jnp.minimum(e * inv_row, 1.0)
    i2t_log = jnp.log(1.0 - i2t + _EPS)

    col_iota = lax.broadcasted_iota(jnp.int32, (tr, m_eff), 1)
    row_iota = lax.broadcasted_iota(jnp.int32, (tr, m_eff), 0)
    diag_mask = col_iota == row_iota + t * tr

    if padded:
        i2t_log = jnp.where(col_iota < m, i2t_log, 0.0)

    i2t_log_rowsum = jnp.sum(i2t_log, axis=1, keepdims=True)     # (tr, 1)
    i2t_diag = jnp.sum(jnp.where(diag_mask, i2t, 0.0), axis=1, keepdims=True)
    i2t_log_diag = jnp.log(1.0 - i2t_diag + _EPS)
    neg_log_i2t_diag = -jnp.log(i2t_diag + _EPS)

    # sublane-oriented (tr, 8) stats block; 0.2% of the tile traffic, so the
    # narrow (8-lane) stores are negligible.
    lane = lax.broadcasted_iota(jnp.int32, (tr, 8), 1)
    stats_ref[...] = jnp.where(
        lane == 0, i2t_log_rowsum,
        jnp.where(lane == 1, i2t_log_diag,
                  jnp.where(lane == 2, neg_log_i2t_diag, 0.0)))


def _ccl_pass2_kernel(csum_ref, s_ref, cpart_ref, stats_ref, *,
                      inv_tau, m, m_eff, tr, padded):
    """t2i (column-normalized) stats from the reduced column sums."""
    t = pl.program_id(0)
    s = s_ref[...].astype(jnp.float32)
    e = jnp.exp(s * inv_tau)                                     # (tr, m_eff)

    inv_col = pl.reciprocal(csum_ref[...] + _EPS, approx=True)   # (1, m_eff)
    t2i = jnp.minimum(e * inv_col, 1.0)
    t2i_log = jnp.log(1.0 - t2i + _EPS)

    col_iota = lax.broadcasted_iota(jnp.int32, (tr, m_eff), 1)
    row_iota = lax.broadcasted_iota(jnp.int32, (tr, m_eff), 0)
    diag_mask = col_iota == row_iota + t * tr

    if padded:
        t2i_log = jnp.where(row_iota + t * tr < m, t2i_log, 0.0)

    # per-tile partial column sums of log(1 - t2i + eps); lean (1,1,m_eff) out.
    cpart_ref[...] = jnp.sum(t2i_log, axis=0, keepdims=True).reshape(1, 1, m_eff)

    t2i_diag = jnp.sum(jnp.where(diag_mask, t2i, 0.0), axis=1, keepdims=True)
    t2i_log_diag = jnp.log(1.0 - t2i_diag + _EPS)
    neg_log_t2i_diag = -jnp.log(t2i_diag + _EPS)

    lane = lax.broadcasted_iota(jnp.int32, (tr, 8), 1)
    stats_ref[...] = jnp.where(
        lane == 0, t2i_log_diag,
        jnp.where(lane == 1, neg_log_t2i_diag, 0.0))


@functools.partial(jax.jit, static_argnums=(1, 2))
def _ccl_stats_tiled(scores, tau, max_tile_rows=None):
    m = scores.shape[0]
    assert scores.shape == (m, m)
    inv_tau = 1.0 / float(tau)

    cap = _vmem_capacity_bytes()
    big_vmem = cap >= 100 * _MIB                      # 128 MiB parts (v5e/v6e)
    tile_budget = (6 if big_vmem else 2) * _MIB
    vmem_limit = (64 if big_vmem else 32) * _MIB

    padded = (m % 128) != 0
    m_eff = _round_up(m, 128) if padded else m
    s = scores
    if padded:
        # pad only ragged shapes, at native dtype (no f32 cast copy)
        s = jnp.pad(s, ((0, m_eff - m), (0, m_eff - m)),
                    constant_values=_PAD_NEG)

    if max_tile_rows is not None:                     # test hook
        tile_budget = min(tile_budget, int(max_tile_rows) * 4 * m_eff)
    tr = _pick_row_tile(m_eff, tile_budget)
    n_tiles = m_eff // tr
    n_bytes = int(s.dtype.itemsize)

    # ---- pass 1: exp + i2t stats + partial colsums (fully parallel) --------
    colsum_parts, i2t_stats = pl.pallas_call(
        functools.partial(_ccl_pass1_kernel, inv_tau=inv_tau, m=m,
                          m_eff=m_eff, tr=tr, padded=padded),
        out_shape=(jax.ShapeDtypeStruct((n_tiles, 1, m_eff), jnp.float32),
                   jax.ShapeDtypeStruct((m_eff, 8), jnp.float32)),
        grid=(n_tiles,),
        in_specs=[pl.BlockSpec((tr, m_eff), lambda t: (t, 0))],
        out_specs=(pl.BlockSpec((1, 1, m_eff), lambda t: (t, 0, 0)),
                   pl.BlockSpec((tr, 8), lambda t: (t, 0))),
        compiler_params=pltpu.CompilerParams(
            dimension_semantics=("parallel",),
            vmem_limit_bytes=vmem_limit),
        cost_estimate=pl.CostEstimate(
            flops=6 * m_eff * m_eff,
            transcendentals=2 * m_eff * m_eff,
            bytes_accessed=n_bytes * m_eff * m_eff
            + 4 * m_eff * (n_tiles + 8)),
    )(s)

    colsum = jnp.sum(colsum_parts[:, 0, :], axis=0, keepdims=True)  # (1, m_eff)

    # ---- pass 2: t2i stats (fully parallel) ---------------------------------
    t2i_parts, t2i_stats = pl.pallas_call(
        functools.partial(_ccl_pass2_kernel, inv_tau=inv_tau, m=m,
                          m_eff=m_eff, tr=tr, padded=padded),
        out_shape=(jax.ShapeDtypeStruct((n_tiles, 1, m_eff), jnp.float32),
                   jax.ShapeDtypeStruct((m_eff, 8), jnp.float32)),
        grid=(n_tiles,),
        in_specs=[pl.BlockSpec((1, m_eff), lambda t: (0, 0)),
                  pl.BlockSpec((tr, m_eff), lambda t: (t, 0))],
        out_specs=(pl.BlockSpec((1, 1, m_eff), lambda t: (t, 0, 0)),
                   pl.BlockSpec((tr, 8), lambda t: (t, 0))),
        compiler_params=pltpu.CompilerParams(
            dimension_semantics=("parallel",),
            vmem_limit_bytes=vmem_limit),
        cost_estimate=pl.CostEstimate(
            flops=6 * m_eff * m_eff,
            transcendentals=2 * m_eff * m_eff,
            bytes_accessed=n_bytes * m_eff * m_eff
            + 4 * m_eff * (n_tiles + 9)),
    )(colsum, s)

    t2i_log_rowsum = jnp.sum(t2i_parts[:, 0, :], axis=0)

    return {
        "i2t_log_rowsum": i2t_stats[:m, 0],
        "t2i_log_rowsum": t2i_log_rowsum[:m],
        "i2t_log_diag": i2t_stats[:m, 1],
        "t2i_log_diag": t2i_stats[:m, 0],
        "loss_i": i2t_stats[:m, 2] + t2i_stats[:m, 1],
    }


def _ccl_stats(scores, tau):
    """Dispatch: VMEM-resident fused kernel for typical batch sizes,
    two-pass tiled kernels for large M."""
    m = scores.shape[0]
    big_vmem = _vmem_capacity_bytes() >= 100 * _MIB
    fast_max = 1024 if big_vmem else 768
    if m <= fast_max:
        return _ccl_stats_fused(scores, float(tau))
    return _ccl_stats_tiled(scores, float(tau))


# ----------------------------------------------------------------------------
# BetaMixture1D (host-side numpy glue, exactly as the reference; scipy's
# beta.pdf replaced by an explicit formula so no external deps are needed)
# ----------------------------------------------------------------------------
def _beta_pdf(x, a, b):
    log_b = math.lgamma(a) + math.lgamma(b) - math.lgamma(a + b)
    with np.errstate(divide="ignore", invalid="ignore"):
        return np.exp((a - 1.0) * np.log(x) + (b - 1.0) * np.log(1.0 - x) - log_b)


def _weighted_mean(x, w):
    return np.sum(w * x) / np.sum(w)


def _fit_beta_weighted(x, w):
    x_bar = _weighted_mean(x, w)
    s2 = _weighted_mean((x - x_bar) ** 2, w)
    alpha = x_bar * (x_bar * (1 - x_bar) / s2 - 1)
    beta = alpha * (1 - x_bar) / x_bar
    return alpha, beta


class BetaMixture1D:
    def __init__(self, max_iters=10, alphas_init=(1, 2), betas_init=(2, 1),
                 weights_init=(0.5, 0.5)):
        self.alphas = np.array(alphas_init, dtype=np.float64)
        self.betas = np.array(betas_init, dtype=np.float64)
        self.weight = np.array(weights_init, dtype=np.float64)
        self.max_iters = max_iters
        self.eps_nan = 1e-12

    def likelihood(self, x, y):
        return _beta_pdf(x, self.alphas[y], self.betas[y])

    def weighted_likelihood(self, x, y):
        return self.weight[y] * self.likelihood(x, y)

    def probability(self, x):
        return sum(self.weighted_likelihood(x, y) for y in range(2))

    def posterior(self, x, y):
        with np.errstate(divide="ignore", invalid="ignore"):
            return self.weighted_likelihood(x, y) / (self.probability(x) + self.eps_nan)

    def responsibilities(self, x):
        r = np.array([self.weighted_likelihood(x, i) for i in range(2)])
        r[r <= self.eps_nan] = self.eps_nan
        r /= r.sum(axis=0)
        return r

    def fit(self, x):
        x = np.copy(x)
        x[x >= 1 - self.eps_nan] = 1 - self.eps_nan
        x[x <= self.eps_nan] = self.eps_nan
        for _ in range(self.max_iters):
            r = self.responsibilities(x)
            self.alphas[0], self.betas[0] = _fit_beta_weighted(x, r[0])
            self.alphas[1], self.betas[1] = _fit_beta_weighted(x, r[1])
            self.weight = r.sum(axis=1)
            self.weight /= self.weight.sum()
        return self


# ----------------------------------------------------------------------------
# CCL forward (wrapper around the Pallas kernels)
# ----------------------------------------------------------------------------
def ccl_forward(scores, bmm, *, tau=0.1, loss_cmcl="infoNCE", loss_gce="log",
                threshold=0.5, margin=0.2, balance1=1.0, balance2=1.0):
    # TODO(synk): only the default loss variants (loss_cmcl='infoNCE',
    # loss_gce='log') are implemented; 'margin'/'max-margin' triplet losses and
    # 'tan'/'abs'/'exp'/'gce'/'infoNCE' gce-losses are not wired into the kernel.
    if loss_cmcl != "infoNCE" or loss_gce != "log":
        raise NotImplementedError("only defaults (infoNCE / log) implemented")

    m = scores.shape[0]
    stats = _ccl_stats(scores, float(tau))
    i2t_log_rowsum = stats["i2t_log_rowsum"]
    t2i_log_rowsum = stats["t2i_log_rowsum"]
    i2t_log_diag = stats["i2t_log_diag"]
    t2i_log_diag = stats["t2i_log_diag"]
    loss_i = stats["loss_i"]

    if bmm == "True":
        # normalize per-sample loss to [0, 1]
        li = np.asarray(jax.device_get(loss_i), dtype=np.float64)
        input_loss = (li - li.min()) / (li.max() - li.min())

        # TODO(synk): the BetaMixture1D EM fit is inherently host-side iterative
        # numpy (as in the reference) — not expressed as a Pallas kernel.
        bm = BetaMixture1D(max_iters=10)
        bm.fit(input_loss)
        prob = bm.posterior(input_loss, 0)
        prob = np.asarray(prob, dtype=np.float64)
        prob[np.isnan(prob)] = 1.0
        if prob.min() > threshold:
            print("No estimated noisy data. Enforce the 1/100 data with small "
                  "probability to be unlabeled.")
            thr = np.sort(prob)[len(prob) // 100]
        else:
            thr = threshold

        labels_np = (prob > thr).astype(np.float32)
        n1 = float(labels_np.sum())
        n2 = float(m) - n1
        labels = jnp.asarray(labels_np)

        if n1 == 0:
            l1 = jnp.float32(0.0)
        else:
            l1 = jnp.sum(loss_i * labels) / n1

        # criterion(x) = -((1 - x + eps).log() * mask).sum(),
        # mask = ones - diag(labels)  ==>  total - sum_i labels_i * diag_log_i
        crit_i2t = -(jnp.sum(i2t_log_rowsum) - jnp.sum(labels * i2t_log_diag))
        crit_t2i = -(jnp.sum(t2i_log_rowsum) - jnp.sum(labels * t2i_log_diag))
        if n2 == 0:
            l2 = jnp.float32(0.0)
        else:
            l2 = (crit_i2t + crit_t2i) / (m * (m - 1) + n2)

        return balance1 * l1 + balance2 * l2
    else:
        # mask = ones - eye; criterion(x) = -((1-x+eps).log() * mask).sum(1).mean()
        crit_i2t = -jnp.mean(i2t_log_rowsum - i2t_log_diag)
        crit_t2i = -jnp.mean(t2i_log_rowsum - t2i_log_diag)
        return crit_i2t + crit_t2i


# ----------------------------------------------------------------------------
if __name__ == "__main__":
    key0, key1 = jax.random.split(jax.random.PRNGKey(0))
    M = 8
    # scores ~ cosine-similarity-like values
    scores = (jax.random.normal(key0, (M, M), dtype=jnp.float32) * 0.1).clip(-1.0, 1.0)

    # pure-JAX reference for the bmm='False' path
    def _ref_plain(sc, tau=0.1, eps=1e-6):
        e = jnp.exp(sc / tau)
        i2t = e / (jnp.sum(e, axis=1, keepdims=True) + eps)
        t2i = e.T / (jnp.sum(e.T, axis=1, keepdims=True) + eps)
        msk = 1.0 - jnp.eye(sc.shape[0], dtype=jnp.float32)
        crit = lambda x: -jnp.mean(jnp.sum(jnp.log(1.0 - x + eps) * msk, axis=1))
        return crit(i2t) + crit(t2i)

    loss_plain = jax.block_until_ready(jnp.asarray(ccl_forward(scores, bmm="False")))
    ref_plain = jax.block_until_ready(_ref_plain(scores))
    np.testing.assert_allclose(float(loss_plain), float(ref_plain),
                               rtol=5e-2, atol=1e-3)

    loss_bmm = jax.block_until_ready(jnp.asarray(ccl_forward(scores, bmm="True")))
    assert np.isfinite(float(loss_plain))
    assert np.isfinite(float(loss_bmm))

    # exercise the tiled two-pass path (ragged size, multiple tiles, padded
    # branch) and cross-check it against the fused path
    M2 = 200
    scores2 = (jax.random.normal(key1, (M2, M2), dtype=jnp.float32) * 0.1).clip(-1.0, 1.0)
    st_fused = jax.block_until_ready(_ccl_stats_fused(scores2, 0.1))
    st_tiled = jax.block_until_ready(_ccl_stats_tiled(scores2, 0.1, 128))
    for k in st_fused:
        np.testing.assert_allclose(np.asarray(st_tiled[k]), np.asarray(st_fused[k]),
                                   rtol=2e-2, atol=2e-2)

    print("KERNEL_OK")
</pallas_src>

<mosaic_0001>
module attributes {stable_mosaic.version = 11 : i64} {
  func.func @_ccl_fused_kernel(%arg0: memref<8x8xf32, #tpu.memory_space<vmem>>, %arg1: memref<8x8xf32, #tpu.memory_space<vmem>>) attributes {dimension_semantics = [], scalar_prefetch = 0 : i64, scratch_operands = 0 : i64, tpu.core_type = #tpu.core_type<tc>} {
    %c0 = arith.constant 0 : index
    %c0_0 = arith.constant 0 : index
    %0 = vector.load %arg0[%c0, %c0_0] : memref<8x8xf32, #tpu.memory_space<vmem>>, vector<8x8xf32>
    %cst = arith.constant 1.000000e+01 : f32
    %1 = vector.broadcast %cst : f32 to vector<8x8xf32>
    %2 = arith.mulf %0, %1 : vector<8x8xf32>
    %cst_1 = arith.constant dense<0xFF800000> : vector<8xf32>
    %3 = vector.multi_reduction <maximumf>, %2, %cst_1 [1] : vector<8x8xf32> to vector<8xf32>
    %4 = vector.shape_cast %3 : vector<8xf32> to vector<8x1xf32>
    %cst_2 = arith.constant dense<0xFF800000> : vector<1xf32>
    %5 = vector.multi_reduction <maximumf>, %4, %cst_2 [0] : vector<8x1xf32> to vector<1xf32>
    %6 = vector.shape_cast %5 : vector<1xf32> to vector<1x1xf32>
    %7 = vector.broadcast %6 : vector<1x1xf32> to vector<8x8xf32>
    %8 = arith.subf %2, %7 : vector<8x8xf32>
    %9 = math.exp %8 : vector<8x8xf32>
    %cst_3 = arith.constant dense<0.000000e+00> : vector<8xf32>
    %10 = vector.multi_reduction <add>, %9, %cst_3 [1] : vector<8x8xf32> to vector<8xf32>
    %11 = vector.shape_cast %10 : vector<8xf32> to vector<8x1xf32>
    %cst_4 = arith.constant dense<0.000000e+00> : vector<8xf32>
    %12 = vector.multi_reduction <add>, %9, %cst_4 [0] : vector<8x8xf32> to vector<8xf32>
    %13 = vector.shape_cast %12 : vector<8xf32> to vector<1x8xf32>
    %cst_5 = arith.constant 9.99999997E-7 : f32
    %14 = vector.broadcast %cst_5 : f32 to vector<8x1xf32>
    %15 = arith.addf %11, %14 : vector<8x1xf32>
    %16 = tpu.reciprocal %15 {approx = true} : vector<8x1xf32> -> vector<8x1xf32>
    %cst_6 = arith.constant 9.99999997E-7 : f32
    %17 = vector.broadcast %cst_6 : f32 to vector<1x8xf32>
    %18 = arith.addf %13, %17 : vector<1x8xf32>
    %19 = tpu.reciprocal %18 {approx = true} : vector<1x8xf32> -> vector<1x8xf32>
    %20 = vector.broadcast %16 : vector<8x1xf32> to vector<8x8xf32>
    %21 = arith.mulf %9, %20 : vector<8x8xf32>
    %cst_7 = arith.constant 1.000000e+00 : f32
    %22 = vector.broadcast %cst_7 : f32 to vector<8x8xf32>
    %23 = arith.minimumf %21, %22 : vector<8x8xf32>
    %24 = vector.broadcast %19 : vector<1x8xf32> to vector<8x8xf32>
    %25 = arith.mulf %9, %24 : vector<8x8xf32>
    %cst_8 = arith.constant 1.000000e+00 : f32
    %26 = vector.broadcast %cst_8 : f32 to vector<8x8xf32>
    %27 = arith.minimumf %25, %26 : vector<8x8xf32>
    %cst_9 = arith.constant 1.000000e+00 : f32
    %28 = vector.broadcast %cst_9 : f32 to vector<8x8xf32>
    %29 = arith.subf %28, %23 : vector<8x8xf32>
    %cst_10 = arith.constant 9.99999997E-7 : f32
    %30 = vector.broadcast %cst_10 : f32 to vector<8x8xf32>
    %31 = arith.addf %29, %30 : vector<8x8xf32>
    %32 = math.log %31 : vector<8x8xf32>
    %cst_11 = arith.constant 1.000000e+00 : f32
    %33 = vector.broadcast %cst_11 : f32 to vector<8x8xf32>
    %34 = arith.subf %33, %27 : vector<8x8xf32>
    %cst_12 = arith.constant 9.99999997E-7 : f32
    %35 = vector.broadcast %cst_12 : f32 to vector<8x8xf32>
    %36 = arith.addf %34, %35 : vector<8x8xf32>
    %37 = math.log %36 : vector<8x8xf32>
    %38 = tpu.iota {dimensions = array<i32: 0>} : vector<8x8xi32>
    %39 = tpu.iota {dimensions = array<i32: 1>} : vector<8x8xi32>
    %40 = arith.cmpi eq, %38, %39 : vector<8x8xi32>
    %cst_13 = arith.constant 0.000000e+00 : f32
    %41 = vector.broadcast %cst_13 : f32 to vector<8x8xf32>
    %42 = arith.select %40, %23, %41 : vector<8x8xi1>, vector<8x8xf32>
    %cst_14 = arith.constant dense<0.000000e+00> : vector<8xf32>
    %43 = vector.multi_reduction <add>, %42, %cst_14 [0] : vector<8x8xf32> to vector<8xf32>
    %44 = vector.shape_cast %43 : vector<8xf32> to vector<1x8xf32>
    %cst_15 = arith.constant 0.000000e+00 : f32
    %45 = vector.broadcast %cst_15 : f32 to vector<8x8xf32>
    %46 = arith.select %40, %27, %45 : vector<8x8xi1>, vector<8x8xf32>
    %cst_16 = arith.constant dense<0.000000e+00> : vector<8xf32>
    %47 = vector.multi_reduction <add>, %46, %cst_16 [0] : vector<8x8xf32> to vector<8xf32>
    %48 = vector.shape_cast %47 : vector<8xf32> to vector<1x8xf32>
    %cst_17 = arith.constant dense<0.000000e+00> : vector<8xf32>
    %49 = vector.multi_reduction <add>, %32, %cst_17 [1] : vector<8x8xf32> to vector<8xf32>
    %50 = vector.shape_cast %49 : vector<8xf32> to vector<8x1xf32>
    %cst_18 = arith.constant 0.000000e+00 : f32
    %51 = vector.shape_cast %50 : vector<8x1xf32> to vector<8x1xf32>
    %52 = vector.broadcast %51 : vector<8x1xf32> to vector<8x8xf32>
    %53 = vector.broadcast %cst_18 : f32 to vector<8x8xf32>
    %54 = arith.select %40, %52, %53 : vector<8x8xi1>, vector<8x8xf32>
    %cst_19 = arith.constant dense<0.000000e+00> : vector<8xf32>
    %55 = vector.multi_reduction <add>, %54, %cst_19 [0] : vector<8x8xf32> to vector<8xf32>
    %56 = vector.shape_cast %55 : vector<8xf32> to vector<1x8xf32>
    %cst_20 = arith.constant dense<0.000000e+00> : vector<8xf32>
    %57 = vector.multi_reduction <add>, %37, %cst_20 [0] : vector<8x8xf32> to vector<8xf32>
    %58 = vector.shape_cast %57 : vector<8xf32> to vector<1x8xf32>
    %cst_21 = arith.constant 1.000000e+00 : f32
    %59 = vector.broadcast %cst_21 : f32 to vector<1x8xf32>
    %60 = arith.subf %59, %44 : vector<1x8xf32>
    %cst_22 = arith.constant 9.99999997E-7 : f32
    %61 = vector.broadcast %cst_22 : f32 to vector<1x8xf32>
    %62 = arith.addf %60, %61 : vector<1x8xf32>
    %63 = math.log %62 : vector<1x8xf32>
    %cst_23 = arith.constant 1.000000e+00 : f32
    %64 = vector.broadcast %cst_23 : f32 to vector<1x8xf32>
    %65 = arith.subf %64, %48 : vector<1x8xf32>
    %cst_24 = arith.constant 9.99999997E-7 : f32
    %66 = vector.broadcast %cst_24 : f32 to vector<1x8xf32>
    %67 = arith.addf %65, %66 : vector<1x8xf32>
    %68 = math.log %67 : vector<1x8xf32>
    %cst_25 = arith.constant 9.99999997E-7 : f32
    %69 = vector.broadcast %cst_25 : f32 to vector<1x8xf32>
    %70 = arith.addf %44, %69 : vector<1x8xf32>
    %71 = math.log %70 : vector<1x8xf32>
    %cst_26 = arith.constant 0.000000e+00 : f32
    %72 = vector.broadcast %cst_26 : f32 to vector<1x8xf32>
    %73 = arith.subf %72, %71 : vector<1x8xf32>
    %cst_27 = arith.constant 9.99999997E-7 : f32
    %74 = vector.broadcast %cst_27 : f32 to vector<1x8xf32>
    %75 = arith.addf %48, %74 : vector<1x8xf32>
    %76 = math.log %75 : vector<1x8xf32>
    %77 = arith.subf %73, %76 : vector<1x8xf32>
    %cst_28 = arith.constant 0.000000e+00 : f32
    %78 = vector.broadcast %cst_28 : f32 to vector<1x8xf32>
    %79 = tpu.concatenate %56, %58, %63, %68, %77, %78, %78, %78 in 0 : vector<1x8xf32>, vector<1x8xf32>, vector<1x8xf32>, vector<1x8xf32>, vector<1x8xf32>, vector<1x8xf32>, vector<1x8xf32>, vector<1x8xf32> -> vector<8x8xf32>
    %c0_29 = arith.constant 0 : index
    %c0_30 = arith.constant 0 : index
    %80 = vector.load %arg1[%c0_29, %c0_30] : memref<8x8xf32, #tpu.memory_space<vmem>>, vector<8x8xf32>
    tpu.vector_store %arg1[%c0_29, %c0_30], %79 {strides = array<i32>} : memref<8x8xf32, #tpu.memory_space<vmem>>, vector<8x8xf32>,
    return
  }
}

</mosaic_0001>

<bundles_post_ra>
// kernel: _ccl_stats_fused.1
= control target key start
LH: loop header
LB: loop body
LE: loop exit
PB: predicated region body
PF: predicated region fallthrough
CT: control target
= control target key end

     0   :  { %6 = vsyncpa [#allocation3], 0  ;;  %s182_s9 = smov [#allocation2]   ;;  %s210_s0 = inlined_call_operand.hbm [shape: f32[8,8], index: 0, kind: input, shape index: {}]   ;;  %s211_s1 = inlined_call_operand.vmem [shape: f32[8,8], index: 1, kind: output, shape index: {}]  }
   0x1   :  { %s12_s8 = sshll.u32 %s210_s0, 4  ;;  %s14_s10 = sshll.u32 %s182_s9, 4  ;;  %s13_s8 = int_to_ptr.hbm [resolvable:$true] %s12_s8  ;;  %s15_s10 = int_to_ptr.vmem [resolvable:$true] %s14_s10 }
   0x2   :  { %17 = dma.hbm_to_vmem [thread:$0]  %s13_s8, 128, %s15_s10, [#allocation3]  }
   0x3   :  { %180 = dma.done.wait [#allocation3], 128  }
   0x4   :  { %181 = vsyncadd [#allocation3], 4294967168  ;;  %v22_v0 = vld [vmem:[#allocation2] sm:$0xff]  ;;  %vm24_vm0 = vcmask 64512   ;;  %v62_v22 = vlaneseq  ;;  %vm117_vm2 = vcmask 1040384   ;;  %vm119_vm3 = vcmask 1041408  }
   0x5   :  { %v23_v1 = vmul.f32 10.0, %v22_v0  ;;  %vm121_vm4 = vcmask 1042432   ;;  %vm123_vm5 = vcmask 1043456   ;;  %vm125_vm6 = vcmask 1044480  }
   0x6   :  { %v63_v24 = vshrl.u32 %v62_v22, 7  ;;  %v65_v25 = vand.u32 127, %v62_v22  ;;  %vm127_vm7 = vcmask 1045504   ;;  %vm129_vm8 = vcmask 1046528  }
   0x7   :  { %v25_v2 = vsel %vm24_vm0, %v23_v1, -inf }
   0x8   :  { %26 = vmax.xlane.f32.xlu0 %v25_v2  ;;  %vm66_vm1 = vcmp.eq.s32.totalorder %v63_v24, %v65_v25 }
  0x7b   :  { %v27_v3 = vpop.xlane.xlu0 %26 }
  0x7c   :  { %v28_v4 = vrot.slane %v27_v3, 4 }
  0x7e   :  { %v29_v5 = vmax.f32 %v27_v3, %v28_v4 }
  0x80   :  { %v30_v6 = vrot.slane %v29_v5, 2 }
  0x82   :  { %v31_v7 = vmax.f32 %v29_v5, %v30_v6 }
  0x84   :  { %v32_v8 = vrot.slane %v31_v7, 1 }
  0x86   :  { %v33_v9 = vmax.f32 %v31_v7, %v32_v8 }
  0x88   :  { %v34_v10 = vsub.f32 %v23_v1, %v33_v9 }
  0x8a   :  { %v35_v11 = vmul.f32 1.442695, %v34_v10 }
  0x8c   :  { %138 = vpow2.f32 %v35_v11 }
  0x92   :  { %v139_v12 = vpop.eup %138 }
  0x93   :  { %v37_v13 = vsel %vm24_vm0, %v139_v12, 0.0 }
  0x94   :  { %38 = vadd.xlane.f32.xlu0 %v37_v13  ;;  %v40_v14 = vrot.slane %v37_v13, 4 }
  0x96   :  { %v41_v15 = vadd.f32 %v40_v14, %v37_v13 }
  0x98   :  { %v42_v16 = vrot.slane %v41_v15, 2 }
  0x9a   :  { %v43_v17 = vadd.f32 %v42_v16, %v41_v15 }
  0x9c   :  { %v44_v18 = vrot.slane %v43_v17, 1 }
  0x9e   :  { %v45_v19 = vadd.f32 %v44_v18, %v43_v17 }
  0xa0   :  { %v48_v20 = vadd.f32 1e-06, %v45_v19 }
  0xa2   :  { %140 = vrcp.f32 %v48_v20 }
  0xa8   :  { %v141_v21 = vpop.eup %140 }
  0xa9   :  { %v52_v23 = vmul.f32 %v141_v21, %v139_v12 }
  0xab   :  { %v53_v26 = vmin.f32 %v52_v23, 1.0 }
  0xad   :  { %v75_v27 = vsel %vm66_vm1, %v53_v26, 0.0  ;;  %v58_v61 = vsub.f32 1.0, %v53_v26 }
  0xae   :  { %v76_v28 = vsel %vm24_vm0, %v75_v27, 0.0 }
  0xaf   :  { %v77_v31 = vrot.slane %v76_v28, 4  ;;  %v59_v62 = vadd.f32 1e-06, %v58_v61 }
  0xb1   :  { %v78_v32 = vadd.f32 %v77_v31, %v76_v28 }
  0xb3   :  { %v79_v34 = vrot.slane %v78_v32, 2 }
  0xb5   :  { %v80_v37 = vadd.f32 %v79_v34, %v78_v32 }
  0xb7   :  { %v81_v43 = vrot.slane %v80_v37, 1 }
  0xb9   :  { %v82_v46 = vadd.f32 %v81_v43, %v80_v37 }
  0xbb   :  { %v113_v51 = vadd.f32 1e-06, %v82_v46  ;;  %v105_v5 = vsub.f32 1.0, %v82_v46 }
  0xbd   :  { %v106_v11 = vadd.f32 1e-06, %v105_v5 }
 0x107   :  { %v39_v29 = vpop.xlane.xlu0 %38 }
 0x108   :  { %v46_v30 = vadd.f32 1e-06, %v39_v29 }
 0x10a   :  { %142 = vrcp.f32 %v46_v30 }
 0x110   :  { %v143_v33 = vpop.eup %142 }
 0x111   :  { %v50_v35 = vmul.f32 %v143_v33, %v139_v12 }
 0x113   :  { %v51_v36 = vmin.f32 %v50_v35, 1.0 }
 0x115   :  { %v54_v38 = vsub.f32 1.0, %v51_v36  ;;  %v67_v39 = vsel %vm66_vm1, %v51_v36, 0.0 }
 0x116   :  { %v68_v40 = vsel %vm24_vm0, %v67_v39, 0.0 }
 0x117   :  { %v55_v41 = vadd.f32 1e-06, %v54_v38  ;;  %v69_v42 = vrot.slane %v68_v40, 4 }
 0x119   :  { %144 = vlog2.f32 %v55_v41  ;;  %v70_v44 = vadd.f32 %v69_v42, %v68_v40 }
 0x11a   :  { %146 = vlog2.f32 %v113_v51 }
 0x11b   :  { %v71_v45 = vrot.slane %v70_v44, 2 }
 0x11d   :  { %v72_v47 = vadd.f32 %v71_v45, %v70_v44 }
 0x11f   :  { %v145_v48 = vpop.eup %144  ;;  %v73_v49 = vrot.slane %v72_v47, 1 }
 0x120   :  { %v57_v50 = vmul.f32 0.6931472, %v145_v48  ;;  %v147_v55 = vpop.eup %146 }
 0x121   :  { %v74_v52 = vadd.f32 %v73_v49, %v72_v47  ;;  %v115_v59 = vmul.f32 0.6931472, %v147_v55 }
 0x122   :  { %v83_v53 = vsel %vm24_vm0, %v57_v50, 0.0 }
 0x123   :  { %84 = vadd.xlane.f32.xlu1 %v83_v53  ;;  %v109_v54 = vadd.f32 1e-06, %v74_v52  ;;  %v101_v3 = vsub.f32 1.0, %v74_v52 }
 0x125   :  { %148 = vlog2.f32 %v109_v54  ;;  %v102_v7 = vadd.f32 1e-06, %v101_v3 }
 0x126   :  { %150 = vlog2.f32 %v59_v62 }
 0x127   :  { %152 = vlog2.f32 %v102_v7 }
 0x128   :  { %154 = vlog2.f32 %v106_v11 }
 0x12b   :  { %v149_v56 = vpop.eup %148 }
 0x12c   :  { %v111_v57 = vmul.f32 0.6931472, %v149_v56  ;;  %v151_v63 = vpop.eup %150 }
 0x12d   :  { %v61_v0 = vmul.f32 0.6931472, %v151_v63  ;;  %v153_v18 = vpop.eup %152 }
 0x12e   :  { %v112_v58 = vsub.f32 0.0, %v111_v57  ;;  %v155_v20 = vpop.eup %154  ;;  %v104_v23 = vmul.f32 0.6931472, %v153_v18 }
 0x12f   :  { %v94_v1 = vsel %vm24_vm0, %v61_v0, 0.0  ;;  %v108_v24 = vmul.f32 0.6931472, %v155_v20 }
 0x130   :  { %v116_v60 = vsub.f32 %v112_v58, %v115_v59  ;;  %v95_v2 = vrot.slane %v94_v1, 4 }
 0x132   :  { %v96_v4 = vadd.f32 %v95_v2, %v94_v1 }
 0x134   :  { %v97_v9 = vrot.slane %v96_v4, 2 }
 0x136   :  { %v98_v14 = vadd.f32 %v97_v9, %v96_v4 }
 0x138   :  { %v99_v17 = vrot.slane %v98_v14, 1 }
 0x13a   :  { %v100_v22 = vadd.f32 %v99_v17, %v98_v14 }
 0x196   :  { %v85_v6 = vpop.xlane.xlu1 %84 }
 0x197   :  { %v86_v8 = vsel %vm66_vm1, %v85_v6, 0.0 }
 0x198   :  { %v87_v10 = vsel %vm24_vm0, %v86_v8, 0.0 }
 0x199   :  { %v88_v12 = vrot.slane %v87_v10, 4 }
 0x19b   :  { %v89_v13 = vadd.f32 %v88_v12, %v87_v10 }
 0x19d   :  { %v90_v15 = vrot.slane %v89_v13, 2 }
 0x19f   :  { %v91_v16 = vadd.f32 %v90_v15, %v89_v13 }
 0x1a1   :  { %v92_v19 = vrot.slane %v91_v16, 1 }
 0x1a3   :  { %v93_v21 = vadd.f32 %v92_v19, %v91_v16 }
 0x1a5   :  { %v118_v25 = vsel %vm117_vm2, %v93_v21, %v100_v22 }
 0x1a6   :  { %v120_v26 = vsel %vm119_vm3, %v118_v25, %v104_v23 }
 0x1a7   :  { %v122_v27 = vsel %vm121_vm4, %v120_v26, %v108_v24 }
 0x1a8   :  { %v124_v28 = vsel %vm123_vm5, %v122_v27, %v116_v60 }
 0x1a9   :  { %v126_v29 = vsel %vm125_vm6, %v124_v28, 0.0 }
 0x1aa   :  { %v128_v30 = vsel %vm127_vm7, %v126_v29, 0.0 }
 0x1ab   :  { %v130_v31 = vsel %vm129_vm8, %v128_v30, 0.0 }
 0x1ac   :  { %131 = vst.msk [vmem:[%s211_s1] sm:$0xff] %vm24_vm0, %v130_v31 }
 0x1ad   :  { %136 = vsyncpa [#allocation3], 1 }

</bundles_post_ra>
